<compile_context>
chip_gen: v5e
topology: v5e:2x2
jax: 0.10.0
libtpu: 0.0.40
codegen_flags: <defaults>
</compile_context>

<pallas_src>
import math
from functools import lru_cache

import jax
import jax.numpy as jnp
from jax.experimental import pallas as pl
from jax.experimental.pallas import tpu as pltpu


def _round_up(x, m):
    return ((x + m - 1) // m) * m


# ---------------------------------------------------------------------------
# Per-generation configuration (VMEM limits / epilogue dtype policy).
# ---------------------------------------------------------------------------
@lru_cache(maxsize=1)
def _tpu_config():
    try:
        kind = jax.devices()[0].device_kind.lower()
    except Exception:
        kind = ""
    if "v6" in kind:
        # v6e: 128 MiB physical VMEM (32 MiB default scoped), bf16 VALU present.
        return {"gen": "v6e", "vmem_limit": 64 << 20, "budget": 48 << 20,
                "bf16_epilogue": True}
    if "v7" in kind or "7x" in kind:
        # v7x: only 64 MiB VMEM per TC and both TCs hold a resident weight copy.
        return {"gen": "v7x", "vmem_limit": 48 << 20, "budget": 40 << 20,
                "bf16_epilogue": True}
    if "v5 lite" in kind or "v5e" in kind or "v5lite" in kind:
        # v5e: 128 MiB physical (16 MiB default scoped limit), no bf16 VALU.
        return {"gen": "v5e", "vmem_limit": 64 << 20, "budget": 40 << 20,
                "bf16_epilogue": False}
    # Unknown part (v4 / v5p / interpret): conservative defaults, f32 epilogue.
    return {"gen": "other", "vmem_limit": None, "budget": 24 << 20,
            "bf16_epilogue": False}


# ---------------------------------------------------------------------------
# Kernel: one batch tile of the fused 4-layer MLP.
# ---------------------------------------------------------------------------
def _mlp_kernel(r_ref,
                w1_ref, b1_ref,
                w2_ref, b2_ref,
                w3_ref, b3_ref,
                w4_ref, b4_ref,
                y_ref):
    # r arrives in f32; cast to the MXU compute dtype in-kernel (no extra HBM pass).
    x = r_ref[...].astype(w1_ref.dtype)

    # in_layer + ReLU. Accumulate f32 on the MXU; bias/ReLU epilogue runs in the
    # bias dtype (bf16 on v6e/v7x, f32 on v5e), then cast for the next MXU op.
    h = jnp.dot(x, w1_ref[...], preferred_element_type=jnp.float32)
    h = jnp.maximum(h.astype(b1_ref.dtype) + b1_ref[...], 0.0).astype(w2_ref.dtype)

    # mid_layer + ReLU
    m = jnp.dot(h, w2_ref[...], preferred_element_type=jnp.float32)
    m = jnp.maximum(m.astype(b2_ref.dtype) + b2_ref[...], 0.0).astype(w3_ref.dtype)

    # mid2_layer + ReLU
    m2 = jnp.dot(m, w3_ref[...], preferred_element_type=jnp.float32)
    m2 = jnp.maximum(m2.astype(b3_ref.dtype) + b3_ref[...], 0.0).astype(w4_ref.dtype)

    # out_layer (no activation); final bias is kept in f32.
    y = jnp.dot(m2, w4_ref[...], preferred_element_type=jnp.float32) + b4_ref[...]
    y_ref[...] = y.astype(y_ref.dtype)


# ---------------------------------------------------------------------------
# One-time parameter preparation (hoisted out of the per-call path).
#   PyTorch-style (out, in) weights -> (in, out), hidden dim zero-padded to a
#   multiple of 128 (lane-dense), weights in compute dtype, biases b1..b3 in
#   the epilogue dtype (bf16 on v6e/v7x fast path), final bias b4 in f32.
# ---------------------------------------------------------------------------
def prepare_params(params, compute_dtype=jnp.bfloat16, epilogue_dtype=None, lane=128):
    if epilogue_dtype is None:
        cfg = _tpu_config()
        is_bf16 = jnp.dtype(compute_dtype) == jnp.dtype(jnp.bfloat16)
        epilogue_dtype = jnp.bfloat16 if (is_bf16 and cfg["bf16_epilogue"]) else jnp.float32

    n_hidden, n_inputs = params["w1"].shape
    n_out = params["w4"].shape[0]
    hpad = _round_up(n_hidden, lane)

    def pad_to(x, shape):
        return jnp.pad(x, [(0, s - d) for d, s in zip(x.shape, shape)])

    w1 = pad_to(params["w1"].T, (n_inputs, hpad)).astype(compute_dtype)
    b1 = pad_to(params["b1"].reshape(1, -1), (1, hpad)).astype(epilogue_dtype)
    w2 = pad_to(params["w2"].T, (hpad, hpad)).astype(compute_dtype)
    b2 = pad_to(params["b2"].reshape(1, -1), (1, hpad)).astype(epilogue_dtype)
    w3 = pad_to(params["w3"].T, (hpad, hpad)).astype(compute_dtype)
    b3 = pad_to(params["b3"].reshape(1, -1), (1, hpad)).astype(epilogue_dtype)
    w4 = pad_to(params["w4"].T, (hpad, n_out)).astype(compute_dtype)
    b4 = params["b4"].reshape(1, -1).astype(jnp.float32)
    return {"w1": w1, "b1": b1, "w2": w2, "b2": b2,
            "w3": w3, "b3": b3, "w4": w4, "b4": b4}


# ---------------------------------------------------------------------------
# Batch-tile selection from the real VMEM budget.
# ---------------------------------------------------------------------------
def _choose_tile_m(n_stimuli, n_inputs, hpad, n_out,
                   compute_bytes, epilogue_bytes, vmem_budget,
                   min_steps=4, max_tm=2048):
    # Resident, single-buffered (pl.Buffered(1)) weights + biases.
    resident = (n_inputs * hpad + 2 * hpad * hpad + hpad * n_out) * compute_bytes
    resident += (3 * hpad + n_out) * 4
    avail = max(vmem_budget - resident, 1 << 20)

    # Per-row VMEM: double-buffered f32 r tile + f32 out tile, plus the live
    # in-kernel intermediates (~2 f32 accumulators + epilogue-dtype activation).
    per_row = (2 * n_inputs * 4 + 2 * n_out * 4
               + 2 * hpad * 4 + 2 * hpad * epilogue_bytes)
    tm_budget = max(16, avail // per_row)

    # Keep >= min_steps grid steps: pipelining everywhere, both TCs busy on v7x.
    tm_steps = max(pl.cdiv(n_stimuli, min_steps), 16)

    tm = int(min(tm_budget, tm_steps, max_tm, _round_up(n_stimuli, 16)))
    if tm >= 256:
        tm = (tm // 256) * 256          # whole MXU LHS granules
    else:
        tm = _round_up(max(tm, 16), 16)  # bf16 packs two rows per sublane
    return tm


def _resident_spec(shape, index_map):
    """BlockSpec for data whose block never changes: single-buffer it."""
    try:
        return pl.BlockSpec(shape, index_map, pipeline_mode=pl.Buffered(1))
    except TypeError:  # older jax without pipeline_mode kwarg
        return pl.BlockSpec(shape, index_map)


# ---------------------------------------------------------------------------
# Fused forward pass.
# ---------------------------------------------------------------------------
@jax.jit
def deepnet_relu_forward(r, kparams):
    """r: (n_stimuli, n_inputs) f32; kparams: output of prepare_params()."""
    cfg = _tpu_config()
    n_stimuli, n_inputs = r.shape
    hpad = kparams["w1"].shape[1]
    n_out = kparams["w4"].shape[1]
    compute_bytes = jnp.dtype(kparams["w1"].dtype).itemsize
    epilogue_bytes = jnp.dtype(kparams["b1"].dtype).itemsize

    tm = _choose_tile_m(n_stimuli, n_inputs, hpad, n_out,
                        compute_bytes, epilogue_bytes, cfg["budget"])
    grid = (pl.cdiv(n_stimuli, tm),)

    resident = lambda i: (0, 0)  # weights/biases: same block every grid step
    in_specs = [
        pl.BlockSpec((tm, n_inputs), lambda i: (i, 0)),          # r tile (f32, streamed)
        _resident_spec((n_inputs, hpad), resident),              # w1
        _resident_spec((1, hpad), resident),                     # b1
        _resident_spec((hpad, hpad), resident),                  # w2
        _resident_spec((1, hpad), resident),                     # b2
        _resident_spec((hpad, hpad), resident),                  # w3
        _resident_spec((1, hpad), resident),                     # b3
        _resident_spec((hpad, n_out), resident),                 # w4
        _resident_spec((1, n_out), resident),                    # b4
    ]
    out_specs = pl.BlockSpec((tm, n_out), lambda i: (i, 0))

    cp_kwargs = dict(dimension_semantics=("parallel",))
    if cfg["vmem_limit"] is not None:
        cp_kwargs["vmem_limit_bytes"] = cfg["vmem_limit"]

    return pl.pallas_call(
        _mlp_kernel,
        out_shape=jax.ShapeDtypeStruct((n_stimuli, n_out), jnp.float32),
        grid=grid,
        in_specs=in_specs,
        out_specs=out_specs,
        compiler_params=pltpu.CompilerParams(**cp_kwargs),
    )(r,
      kparams["w1"], kparams["b1"],
      kparams["w2"], kparams["b2"],
      kparams["w3"], kparams["b3"],
      kparams["w4"], kparams["b4"])


# ---------------------------------------------------------------------------
# Init + pure-JAX reference (matches the PyTorch module).
# ---------------------------------------------------------------------------
def init_params(key, n_inputs, n_hidden):
    """nn.Linear default init: U[-1/sqrt(fan_in), 1/sqrt(fan_in)]."""
    def linear_init(k, out_f, in_f):
        k_w, k_b = jax.random.split(k)
        bound = 1.0 / math.sqrt(in_f)
        w = jax.random.uniform(k_w, (out_f, in_f), jnp.float32, -bound, bound)
        b = jax.random.uniform(k_b, (out_f,), jnp.float32, -bound, bound)
        return w, b

    k1, k2, k3, k4 = jax.random.split(key, 4)
    w1, b1 = linear_init(k1, n_hidden, n_inputs)
    w2, b2 = linear_init(k2, n_hidden, n_hidden)
    w3, b3 = linear_init(k3, n_hidden, n_hidden)
    w4, b4 = linear_init(k4, 2, n_hidden)
    return {"w1": w1, "b1": b1, "w2": w2, "b2": b2,
            "w3": w3, "b3": b3, "w4": w4, "b4": b4}


def reference_forward(r, params):
    h = jnp.maximum(r @ params["w1"].T + params["b1"], 0.0)
    m = jnp.maximum(h @ params["w2"].T + params["b2"], 0.0)
    m2 = jnp.maximum(m @ params["w3"].T + params["b3"], 0.0)
    return m2 @ params["w4"].T + params["b4"]


if __name__ == "__main__":
    n_inputs, n_hidden = 64, 32

    key = jax.random.PRNGKey(0)
    k_params, k_small, k_big = jax.random.split(key, 3)
    params = init_params(k_params, n_inputs, n_hidden)

    kparams_f32 = prepare_params(params, compute_dtype=jnp.float32)
    kparams_bf16 = prepare_params(params, compute_dtype=jnp.bfloat16)

    # Case 1: tiny batch (single tile). Case 2: multi-tile with a partial last
    # tile (600 rows is not a multiple of the derived tile), exercising the
    # pipelined / megacore / masked-writeback path.
    for n_stimuli, k_data in ((16, k_small), (600, k_big)):
        r = jax.random.normal(k_data, (n_stimuli, n_inputs), jnp.float32)
        y_ref = reference_forward(r, params)

        # 1) Exact-math check (f32 weights, f32 epilogue): validates grid /
        #    padding / partial-tile handling.
        y_f32 = jax.block_until_ready(deepnet_relu_forward(r, kparams_f32))
        assert y_f32.shape == (n_stimuli, 2), y_f32.shape
        assert jnp.allclose(y_f32, y_ref, atol=1e-5, rtol=1e-5), \
            f"f32 mismatch vs reference (n_stimuli={n_stimuli})"

        # 2) Fast path (bf16 weights, in-kernel bf16 cast of r, f32 MXU acc,
        #    bf16 epilogue on v6e/v7x): loose tolerance vs f32 reference.
        y_bf16 = jax.block_until_ready(deepnet_relu_forward(r, kparams_bf16))
        assert y_bf16.shape == (n_stimuli, 2), y_bf16.shape
        assert jnp.allclose(y_bf16, y_ref, atol=7e-2, rtol=7e-2), \
            f"bf16 mismatch vs reference (n_stimuli={n_stimuli})"

    print("KERNEL_OK")
</pallas_src>

<mosaic_0001>
module attributes {stable_mosaic.version = 11 : i64} {
  func.func @_mlp_kernel(%arg0: i32, %arg1: memref<16x64xf32, #tpu.memory_space<vmem>>, %arg2: memref<64x128xf32, #tpu.memory_space<vmem>>, %arg3: memref<1x128xf32, #tpu.memory_space<vmem>>, %arg4: memref<128x128xf32, #tpu.memory_space<vmem>>, %arg5: memref<1x128xf32, #tpu.memory_space<vmem>>, %arg6: memref<128x128xf32, #tpu.memory_space<vmem>>, %arg7: memref<1x128xf32, #tpu.memory_space<vmem>>, %arg8: memref<128x2xf32, #tpu.memory_space<vmem>>, %arg9: memref<1x2xf32, #tpu.memory_space<vmem>>, %arg10: memref<16x2xf32, #tpu.memory_space<vmem>>) attributes {dimension_semantics = [#tpu.dimension_semantics<parallel>], iteration_bounds = array<i64: 1>, scalar_prefetch = 0 : i64, scratch_operands = 0 : i64, tpu.core_type = #tpu.core_type<tc>, window_params = [{transform_indices = @transform_0, window_bounds = array<i64: 16, 64>}, {pipeline_mode = #tpu.pipeline_mode<synchronous>, transform_indices = @transform_1, window_bounds = array<i64: 64, 128>}, {pipeline_mode = #tpu.pipeline_mode<synchronous>, transform_indices = @transform_2, window_bounds = array<i64: 1, 128>}, {pipeline_mode = #tpu.pipeline_mode<synchronous>, transform_indices = @transform_3, window_bounds = array<i64: 128, 128>}, {pipeline_mode = #tpu.pipeline_mode<synchronous>, transform_indices = @transform_4, window_bounds = array<i64: 1, 128>}, {pipeline_mode = #tpu.pipeline_mode<synchronous>, transform_indices = @transform_5, window_bounds = array<i64: 128, 128>}, {pipeline_mode = #tpu.pipeline_mode<synchronous>, transform_indices = @transform_6, window_bounds = array<i64: 1, 128>}, {pipeline_mode = #tpu.pipeline_mode<synchronous>, transform_indices = @transform_7, window_bounds = array<i64: 128, 2>}, {pipeline_mode = #tpu.pipeline_mode<synchronous>, transform_indices = @transform_8, window_bounds = array<i64: 1, 2>}, {transform_indices = @transform_9, window_bounds = array<i64: 16, 2>}]} {
    %c0 = arith.constant 0 : index
    %c0_0 = arith.constant 0 : index
    %0 = vector.load %arg1[%c0, %c0_0] : memref<16x64xf32, #tpu.memory_space<vmem>>, vector<16x64xf32>
    %c0_1 = arith.constant 0 : index
    %c0_2 = arith.constant 0 : index
    %1 = vector.load %arg2[%c0_1, %c0_2] : memref<64x128xf32, #tpu.memory_space<vmem>>, vector<64x128xf32>
    %cst = arith.constant dense<0.000000e+00> : vector<16x128xf32>
    %2 = tpu.matmul %0, %1, %cst {dimension_numbers = #tpu.dot_dimension_numbers<[1], [0], [0], [1], [0, 0, 1, 1], [], []>} : vector<16x64xf32>, vector<64x128xf32>, vector<16x128xf32> -> vector<16x128xf32>
    %c0_3 = arith.constant 0 : index
    %c0_4 = arith.constant 0 : index
    %3 = vector.load %arg3[%c0_3, %c0_4] : memref<1x128xf32, #tpu.memory_space<vmem>>, vector<1x128xf32>
    %4 = vector.broadcast %3 : vector<1x128xf32> to vector<16x128xf32>
    %5 = arith.addf %2, %4 : vector<16x128xf32>
    %cst_5 = arith.constant 0.000000e+00 : f32
    %6 = vector.broadcast %cst_5 : f32 to vector<16x128xf32>
    %7 = arith.maximumf %5, %6 : vector<16x128xf32>
    %c0_6 = arith.constant 0 : index
    %c0_7 = arith.constant 0 : index
    %8 = vector.load %arg4[%c0_6, %c0_7] : memref<128x128xf32, #tpu.memory_space<vmem>>, vector<128x128xf32>
    %cst_8 = arith.constant dense<0.000000e+00> : vector<16x128xf32>
    %9 = tpu.matmul %7, %8, %cst_8 {dimension_numbers = #tpu.dot_dimension_numbers<[1], [0], [0], [1], [0, 0, 1, 1], [], []>} : vector<16x128xf32>, vector<128x128xf32>, vector<16x128xf32> -> vector<16x128xf32>
    %c0_9 = arith.constant 0 : index
    %c0_10 = arith.constant 0 : index
    %10 = vector.load %arg5[%c0_9, %c0_10] : memref<1x128xf32, #tpu.memory_space<vmem>>, vector<1x128xf32>
    %11 = vector.broadcast %10 : vector<1x128xf32> to vector<16x128xf32>
    %12 = arith.addf %9, %11 : vector<16x128xf32>
    %cst_11 = arith.constant 0.000000e+00 : f32
    %13 = vector.broadcast %cst_11 : f32 to vector<16x128xf32>
    %14 = arith.maximumf %12, %13 : vector<16x128xf32>
    %c0_12 = arith.constant 0 : index
    %c0_13 = arith.constant 0 : index
    %15 = vector.load %arg6[%c0_12, %c0_13] : memref<128x128xf32, #tpu.memory_space<vmem>>, vector<128x128xf32>
    %cst_14 = arith.constant dense<0.000000e+00> : vector<16x128xf32>
    %16 = tpu.matmul %14, %15, %cst_14 {dimension_numbers = #tpu.dot_dimension_numbers<[1], [0], [0], [1], [0, 0, 1, 1], [], []>} : vector<16x128xf32>, vector<128x128xf32>, vector<16x128xf32> -> vector<16x128xf32>
    %c0_15 = arith.constant 0 : index
    %c0_16 = arith.constant 0 : index
    %17 = vector.load %arg7[%c0_15, %c0_16] : memref<1x128xf32, #tpu.memory_space<vmem>>, vector<1x128xf32>
    %18 = vector.broadcast %17 : vector<1x128xf32> to vector<16x128xf32>
    %19 = arith.addf %16, %18 : vector<16x128xf32>
    %cst_17 = arith.constant 0.000000e+00 : f32
    %20 = vector.broadcast %cst_17 : f32 to vector<16x128xf32>
    %21 = arith.maximumf %19, %20 : vector<16x128xf32>
    %c0_18 = arith.constant 0 : index
    %c0_19 = arith.constant 0 : index
    %22 = vector.load %arg8[%c0_18, %c0_19] : memref<128x2xf32, #tpu.memory_space<vmem>>, vector<128x2xf32>
    %cst_20 = arith.constant dense<0.000000e+00> : vector<16x2xf32>
    %23 = tpu.matmul %21, %22, %cst_20 {dimension_numbers = #tpu.dot_dimension_numbers<[1], [0], [0], [1], [0, 0, 1, 1], [], []>} : vector<16x128xf32>, vector<128x2xf32>, vector<16x2xf32> -> vector<16x2xf32>
    %c0_21 = arith.constant 0 : index
    %c0_22 = arith.constant 0 : index
    %24 = vector.load %arg9[%c0_21, %c0_22] : memref<1x2xf32, #tpu.memory_space<vmem>>, vector<1x2xf32>
    %25 = vector.broadcast %24 : vector<1x2xf32> to vector<16x2xf32>
    %26 = arith.addf %23, %25 : vector<16x2xf32>
    %c0_23 = arith.constant 0 : index
    %c0_24 = arith.constant 0 : index
    %27 = vector.load %arg10[%c0_23, %c0_24] : memref<16x2xf32, #tpu.memory_space<vmem>>, vector<16x2xf32>
    tpu.vector_store %arg10[%c0_23, %c0_24], %26 {strides = array<i32>} : memref<16x2xf32, #tpu.memory_space<vmem>>, vector<16x2xf32>,
    return
  }
  func.func @transform_0(%arg0: i32) -> (i32, i32) {
    %c0_i32 = arith.constant 0 : i32
    %c0_i32_0 = arith.constant 0 : i32
    return %arg0, %c0_i32 : i32, i32
  }
  func.func @transform_1(%arg0: i32) -> (i32, i32) {
    %c0_i32 = arith.constant 0 : i32
    %c0_i32_0 = arith.constant 0 : i32
    %c0_i32_1 = arith.constant 0 : i32
    return %c0_i32, %c0_i32_0 : i32, i32
  }
  func.func @transform_2(%arg0: i32) -> (i32, i32) {
    %c0_i32 = arith.constant 0 : i32
    %c0_i32_0 = arith.constant 0 : i32
    %c0_i32_1 = arith.constant 0 : i32
    return %c0_i32, %c0_i32_0 : i32, i32
  }
  func.func @transform_3(%arg0: i32) -> (i32, i32) {
    %c0_i32 = arith.constant 0 : i32
    %c0_i32_0 = arith.constant 0 : i32
    %c0_i32_1 = arith.constant 0 : i32
    return %c0_i32, %c0_i32_0 : i32, i32
  }
  func.func @transform_4(%arg0: i32) -> (i32, i32) {
    %c0_i32 = arith.constant 0 : i32
    %c0_i32_0 = arith.constant 0 : i32
    %c0_i32_1 = arith.constant 0 : i32
    return %c0_i32, %c0_i32_0 : i32, i32
  }
  func.func @transform_5(%arg0: i32) -> (i32, i32) {
    %c0_i32 = arith.constant 0 : i32
    %c0_i32_0 = arith.constant 0 : i32
    %c0_i32_1 = arith.constant 0 : i32
    return %c0_i32, %c0_i32_0 : i32, i32
  }
  func.func @transform_6(%arg0: i32) -> (i32, i32) {
    %c0_i32 = arith.constant 0 : i32
    %c0_i32_0 = arith.constant 0 : i32
    %c0_i32_1 = arith.constant 0 : i32
    return %c0_i32, %c0_i32_0 : i32, i32
  }
  func.func @transform_7(%arg0: i32) -> (i32, i32) {
    %c0_i32 = arith.constant 0 : i32
    %c0_i32_0 = arith.constant 0 : i32
    %c0_i32_1 = arith.constant 0 : i32
    return %c0_i32, %c0_i32_0 : i32, i32
  }
  func.func @transform_8(%arg0: i32) -> (i32, i32) {
    %c0_i32 = arith.constant 0 : i32
    %c0_i32_0 = arith.constant 0 : i32
    %c0_i32_1 = arith.constant 0 : i32
    return %c0_i32, %c0_i32_0 : i32, i32
  }
  func.func @transform_9(%arg0: i32) -> (i32, i32) {
    %c0_i32 = arith.constant 0 : i32
    %c0_i32_0 = arith.constant 0 : i32
    return %arg0, %c0_i32 : i32, i32
  }
}

</mosaic_0001>

<bundles_post_ra>
// kernel: deepnet_relu_forward.1
= control target key start
LH: loop header
LB: loop body
LE: loop exit
PB: predicated region body
PF: predicated region fallthrough
CT: control target
= control target key end

     0   :  { %14 = vsyncpa [#allocation3], 0  ;;  %s575_s0 = inlined_call_operand.hbm [shape: f32[16,64], index: 0, kind: input, shape index: {}]   ;;  %s576_s1 = inlined_call_operand.hbm [shape: f32[64,128], index: 1, kind: input, shape index: {}]   ;;  %s577_s2 = inlined_call_operand.vmem [shape: f32[1,128], index: 2, kind: input, shape index: {}]   ;;  %s578_s3 = inlined_call_operand.vmem [shape: f32[128,128], index: 3, kind: input, shape index: {}]   ;;  %s579_s4 = inlined_call_operand.vmem [shape: f32[1,128], index: 4, kind: input, shape index: {}]   ;;  %s580_s5 = inlined_call_operand.hbm [shape: f32[128,128], index: 5, kind: input, shape index: {}]   ;;  %s581_s6 = inlined_call_operand.vmem [shape: f32[1,128], index: 6, kind: input, shape index: {}]   ;;  %s582_s7 = inlined_call_operand.vmem [shape: f32[128,2], index: 7, kind: input, shape index: {}]   ;;  %s583_s8 = inlined_call_operand.hbm [shape: f32[1,2], index: 8, kind: input, shape index: {}]   ;;  %s584_s9 = inlined_call_operand.vmem [shape: f32[16,2], index: 9, kind: output, shape index: {}]  }
   0x1   :  { %15 = vsyncpa [#allocation5], 0 }
   0x2   :  { %16 = vsyncpa [#allocation8], 0  ;;  %s34_s11 = sshll.u32 %s576_s1, 4  ;;  %s396_s12 = smov [#allocation4]   ;;  %s35_s11 = int_to_ptr.hbm [resolvable:$true] %s34_s11 }
   0x3   :  { %s36_s13 = sshll.u32 %s396_s12, 4  ;;  %s21_s16 = sshll.u32 %s575_s0, 4  ;;  %s37_s13 = int_to_ptr.vmem [resolvable:$true] %s36_s13  ;;  %s22_s16 = int_to_ptr.hbm [resolvable:$true] %s21_s16 }
   0x4   :  { %s397_s17 = smov 128   ;;  %s398_s18 = smov 8  }
   0x5   :  { %42 = dma.hbm_to_vmem [thread:$0]  %s35_s11, 1024, %s37_s13, [#allocation5], %s397_s17, %s397_s17, %s398_s18  }
   0x6   :  { %s399_s19 = smov [#allocation2]   ;;  %s53_s23 = sshll.u32 %s580_s5, 4  ;;  %s54_s23 = int_to_ptr.hbm [resolvable:$true] %s53_s23 }
   0x7   :  { %s23_s20 = sshll.u32 %s399_s19, 4  ;;  %s71_s25 = sshll.u32 %s583_s8, 4  ;;  %s24_s20 = int_to_ptr.vmem [resolvable:$true] %s23_s20  ;;  %s72_s25 = int_to_ptr.hbm [resolvable:$true] %s71_s25 }
   0x8   :  { %29 = dma.hbm_to_vmem [thread:$0]  %s22_s16, 256, %s24_s20, [#allocation3], %s397_s17, %s397_s17, %s398_s18  }
   0x9   :  { %s400_s26 = smov [#allocation6]   ;;  %s401_s0 = smov [#allocation7]  }
   0xa   :  { %s55_s27 = sshll.u32 %s400_s26, 4  ;;  %s73_s28 = sshll.u32 %s401_s0, 4  ;;  %s56_s27 = int_to_ptr.vmem [resolvable:$true] %s55_s27  ;;  %s74_s28 = int_to_ptr.vmem [resolvable:$true] %s73_s28 }
   0xb   :  { %61 = dma.hbm_to_vmem [thread:$0]  %s54_s23, 2048, %s56_s27, [#allocation5], %s397_s17, %s397_s17, %s398_s18  }
   0xc   :  { %76 = dma.hbm_to_vmem [thread:$0]  %s72_s25, 16, %s74_s28, [#allocation8]  }
   0xd   :  { %390 = dma.done.wait [#allocation3], 256  }
   0xe   :  { %391 = vsyncadd [#allocation3], 4294967040 }
   0xf   :  { %392 = dma.done.wait [#allocation5], 3072  }
  0x10   :  { %393 = vsyncadd [#allocation5], 4294964224 }
  0x11   :  { %394 = dma.done.wait [#allocation8], 16  }
  0x12   :  { %395 = vsyncadd [#allocation8], 4294967280  ;;  %v102_v0 = vld [vmem:[#allocation4 + $0x38] sm:$0xff]  ;;  %v101_v1 = vld [vmem:[#allocation4 + $0x30] sm:$0xff]  ;;  %vm107_vm0 = vcmask 523264   ;;  %vm272_vm1 = vcmask 15360  }
  0x13   :  { %122 = vmatpush.msra.mxu0 %v102_v0  ;;  %v100_v2 = vld [vmem:[#allocation4 + $0x28] sm:$0xff]  ;;  %v153_v4 = vld [vmem:[%s578_s3 + $0x70] sm:$0xff]  ;;  %v152_v6 = vld [vmem:[%s578_s3 + $0x68] sm:$0xff] }
  0x14   :  { %v154_v3 = vld [vmem:[%s578_s3 + $0x78] sm:$0xff]  ;;  %v99_v5 = vld [vmem:[#allocation4 + $0x20] sm:$0xff]  ;;  %v98_v7 = vld [vmem:[#allocation4 + $0x18] sm:$0xff] }
  0x15   :  { %123 = vmatpush.msra.mxu0 %v101_v1  ;;  %159 = vmatpush.msra.mxu1 %v154_v3  ;;  %v151_v8 = vld [vmem:[%s578_s3 + $0x60] sm:$0xff]  ;;  %v150_v10 = vld [vmem:[%s578_s3 + $0x58] sm:$0xff]  ;;  %v149_v12 = vld [vmem:[%s578_s3 + $0x50] sm:$0xff] }
  0x16   :  { %v97_v9 = vld [vmem:[#allocation4 + $0x10] sm:$0xff]  ;;  %v96_v11 = vld [vmem:[#allocation4 + $0x8] sm:$0xff]  ;;  %v95_v13 = vld [vmem:[#allocation4] sm:$0xff] }
  0x17   :  { %124 = vmatpush.msra.mxu0 %v100_v2  ;;  %160 = vmatpush.msra.mxu1 %v153_v4  ;;  %v93_v14 = vld [vmem:[#allocation2] sm:$0xff]  ;;  %v148_v15 = vld [vmem:[%s578_s3 + $0x48] sm:$0xff]  ;;  %v146_v17 = vld [vmem:[%s578_s3 + $0x38] sm:$0xff] }
  0x18   :  { %v147_v16 = vld [vmem:[%s578_s3 + $0x40] sm:$0xff]  ;;  %v145_v18 = vld [vmem:[%s578_s3 + $0x30] sm:$0xff]  ;;  %v94_v19 = vld [vmem:[#allocation2 + $0x8] sm:$0xff] }
  0x19   :  { %125 = vmatpush.msra.mxu0 %v99_v5  ;;  %161 = vmatpush.msra.mxu1 %v152_v6  ;;  %v144_v20 = vld [vmem:[%s578_s3 + $0x28] sm:$0xff]  ;;  %v143_v21 = vld [vmem:[%s578_s3 + $0x20] sm:$0xff]  ;;  %v142_v22 = vld [vmem:[%s578_s3 + $0x18] sm:$0xff] }
  0x1a   :  { %v141_v23 = vld [vmem:[%s578_s3 + $0x10] sm:$0xff]  ;;  %v140_v24 = vld [vmem:[%s578_s3 + $0x8] sm:$0xff]  ;;  %v139_v25 = vld [vmem:[%s578_s3] sm:$0xff] }
  0x1b   :  { %126 = vmatpush.msra.mxu0 %v98_v7  ;;  %162 = vmatpush.msra.mxu1 %v151_v8  ;;  %v199_v26 = vld [vmem:[#allocation6 + $0x78] sm:$0xff]  ;;  %v198_v27 = vld [vmem:[#allocation6 + $0x70] sm:$0xff]  ;;  %v197_v28 = vld [vmem:[#allocation6 + $0x68] sm:$0xff] }
  0x1c   :  { %204 = vmatpush.msra.mxu2 %v199_v26  ;;  %v196_v29 = vld [vmem:[#allocation6 + $0x60] sm:$0xff]  ;;  %v195_v30 = vld [vmem:[#allocation6 + $0x58] sm:$0xff]  ;;  %v194_v31 = vld [vmem:[#allocation6 + $0x50] sm:$0xff] }
  0x1d   :  { %127 = vmatpush.msra.mxu0 %v97_v9  ;;  %163 = vmatpush.msra.mxu1 %v150_v10  ;;  %v193_v32 = vld [vmem:[#allocation6 + $0x48] sm:$0xff]  ;;  %v192_v33 = vld [vmem:[#allocation6 + $0x40] sm:$0xff]  ;;  %v191_v34 = vld [vmem:[#allocation6 + $0x38] sm:$0xff] }
  0x1e   :  { %205 = vmatpush.msra.mxu2 %v198_v27  ;;  %v290_v35 = vld [vmem:[%s577_s2] ss:$0 sm:$0xff]  ;;  %v189_v37 = vld [vmem:[#allocation6 + $0x28] sm:$0xff]  ;;  %v188_v40 = vld [vmem:[#allocation6 + $0x20] sm:$0xff] }
  0x1f   :  { %128 = vmatpush.msra.mxu0 %v96_v11  ;;  %164 = vmatpush.msra.mxu1 %v149_v12  ;;  %v190_v36 = vld [vmem:[#allocation6 + $0x30] sm:$0xff]  ;;  %v187_v42 = vld [vmem:[#allocation6 + $0x18] sm:$0xff]  ;;  %v185_v47 = vld [vmem:[#allocation6 + $0x8] sm:$0xff] }
  0x20   :  { %206 = vmatpush.msra.mxu2 %v197_v28  ;;  %v186_v46 = vld [vmem:[#allocation6 + $0x10] sm:$0xff]  ;;  %v184_v48 = vld [vmem:[#allocation6] sm:$0xff]  ;;  %v244_v49 = vld [vmem:[%s582_s7 + $0x78] sm:$0xff] }
  0x21   :  { %129 = vmatpush.msra.mxu0 %v95_v13  ;;  %165 = vmatpush.msra.mxu1 %v148_v15  ;;  %v243_v50 = vld [vmem:[%s582_s7 + $0x70] sm:$0xff]  ;;  %v242_v51 = vld [vmem:[%s582_s7 + $0x68] sm:$0xff]  ;;  %v241_v52 = vld [vmem:[%s582_s7 + $0x60] sm:$0xff] }
  0x22   :  { %282 = vmatmul.msk.f32.vlgmr.msra.gmra.mxu0 %vm107_vm0, %v93_v14  ;;  %207 = vmatpush.msra.mxu2 %v196_v29  ;;  %v240_v53 = vld [vmem:[%s582_s7 + $0x58] sm:$0xff]  ;;  %v239_v54 = vld [vmem:[%s582_s7 + $0x50] sm:$0xff]  ;;  %v238_v55 = vld [vmem:[%s582_s7 + $0x48] sm:$0xff] }
  0x23   :  { %166 = vmatpush.msra.mxu1 %v147_v16  ;;  %249 = vmatpush.msra.mxu3 %v244_v49  ;;  %v237_v56 = vld [vmem:[%s582_s7 + $0x40] sm:$0xff]  ;;  %v236_v57 = vld [vmem:[%s582_s7 + $0x38] sm:$0xff]  ;;  %v235_v59 = vld [vmem:[%s582_s7 + $0x30] sm:$0xff] }
  0x24   :  { %208 = vmatpush.msra.mxu2 %v195_v30  ;;  %v291_v58 = vld [vmem:[%s579_s4] ss:$0 sm:$0xff]  ;;  %v234_v60 = vld [vmem:[%s582_s7 + $0x28] sm:$0xff]  ;;  %v232_v1 = vld [vmem:[%s582_s7 + $0x18] sm:$0xff] }
  0x25   :  { %167 = vmatpush.msra.mxu1 %v146_v17  ;;  %250 = vmatpush.msra.mxu3 %v243_v50  ;;  %v233_v63 = vld [vmem:[%s582_s7 + $0x20] sm:$0xff]  ;;  %v231_v5 = vld [vmem:[%s582_s7 + $0x10] sm:$0xff]  ;;  %v230_v6 = vld [vmem:[%s582_s7 + $0x8] sm:$0xff] }
  0x26   :  { %209 = vmatpush.msra.mxu2 %v194_v31  ;;  %v229_v7 = vld [vmem:[%s582_s7] sm:$0xff]  ;;  %v293_v15 = vld [vmem:[#allocation7] ss:$0 sm:$0xff] }
  0x27   :  { %168 = vmatpush.msra.mxu1 %v145_v18  ;;  %251 = vmatpush.msra.mxu3 %v242_v51  ;;  %v292_v8 = vld [vmem:[%s581_s6] ss:$0 sm:$0xff] }
  0x28   :  { %210 = vmatpush.msra.mxu2 %v193_v32 }
  0x29   :  { %169 = vmatpush.msra.mxu1 %v144_v20  ;;  %252 = vmatpush.msra.mxu3 %v241_v52 }
  0x2a   :  { %283 = vmatmul.msk.f32.gmra.mxu0 %vm107_vm0, %v94_v19  ;;  %211 = vmatpush.msra.mxu2 %v192_v33 }
  0x2b   :  { %170 = vmatpush.msra.mxu1 %v143_v21  ;;  %253 = vmatpush.msra.mxu3 %v240_v53 }
  0x2c   :  { %212 = vmatpush.msra.mxu2 %v191_v34 }
  0x2d   :  { %171 = vmatpush.msra.mxu1 %v142_v22  ;;  %254 = vmatpush.msra.mxu3 %v239_v54 }
  0x2e   :  { %213 = vmatpush.msra.mxu2 %v190_v36 }
  0x2f   :  { %172 = vmatpush.msra.mxu1 %v141_v23  ;;  %255 = vmatpush.msra.mxu3 %v238_v55 }
  0x30   :  { %214 = vmatpush.msra.mxu2 %v189_v37 }
  0x31   :  { %173 = vmatpush.msra.mxu1 %v140_v24  ;;  %256 = vmatpush.msra.mxu3 %v237_v56 }
  0x32   :  { %215 = vmatpush.msra.mxu2 %v188_v40 }
  0x33   :  { %174 = vmatpush.msra.mxu1 %v139_v25  ;;  %257 = vmatpush.msra.mxu3 %v236_v57 }
  0x34   :  { %216 = vmatpush.msra.mxu2 %v187_v42 }
  0x35   :  { %258 = vmatpush.msra.mxu3 %v235_v59 }
  0x36   :  { %217 = vmatpush.msra.mxu2 %v186_v46 }
  0x37   :  { %259 = vmatpush.msra.mxu3 %v234_v60 }
  0x38   :  { %218 = vmatpush.msra.mxu2 %v185_v47 }
  0x39   :  { %260 = vmatpush.msra.mxu3 %v233_v63 }
  0x3a   :  { %219 = vmatpush.msra.mxu2 %v184_v48 }
  0x3b   :  { %261 = vmatpush.msra.mxu3 %v232_v1 }
  0x3d   :  { %262 = vmatpush.msra.mxu3 %v231_v5 }
  0x3f   :  { %263 = vmatpush.msra.mxu3 %v230_v6 }
  0x41   :  { %264 = vmatpush.msra.mxu3 %v229_v7 }
  0x9f   :  { %v131_v38 = vpop.f32.mrf.mxu0 }
  0xa0   :  { %v132_v39 = vadd.f32 %v290_v35, %v131_v38 }
  0xa2   :  { %v137_v41 = vmax.f32 %v132_v39, 0.0 }
  0xa4   :  { %175 = vmatmul.f32.vlgmr.msra.gmra.mxu1 %v137_v41 }
  0xa7   :  { %v134_v43 = vpop.f32.mrf.mxu0 }
  0xa8   :  { %v135_v44 = vadd.f32 %v290_v35, %v134_v43 }
  0xaa   :  { %v138_v45 = vmax.f32 %v135_v44, 0.0 }
  0xac   :  { %178 = vmatmul.f32.gmra.mxu1 %v138_v45 }
 0x121   :  { %v176_v61 = vpop.f32.mrf.mxu1 }
 0x122   :  { %v177_v62 = vadd.f32 %v291_v58, %v176_v61 }
 0x124   :  { %v182_v0 = vmax.f32 %v177_v62, 0.0 }
 0x126   :  { %220 = vmatmul.f32.vlgmr.msra.gmra.mxu2 %v182_v0 }
 0x129   :  { %v179_v2 = vpop.f32.mrf.mxu1 }
 0x12a   :  { %v180_v3 = vadd.f32 %v291_v58, %v179_v2 }
 0x12c   :  { %v183_v4 = vmax.f32 %v180_v3, 0.0 }
 0x12e   :  { %223 = vmatmul.f32.gmra.mxu2 %v183_v4 }
 0x1a9   :  { %v221_v9 = vpop.f32.mrf.mxu2 }
 0x1aa   :  { %v222_v10 = vadd.f32 %v292_v8, %v221_v9 }
 0x1ac   :  { %v227_v11 = vmax.f32 %v222_v10, 0.0 }
 0x1ae   :  { %265 = vmatmul.f32.vlgmr.msra.gmra.mxu3 %v227_v11 }
 0x1b1   :  { %v224_v12 = vpop.f32.mrf.mxu2 }
 0x1b2   :  { %v225_v13 = vadd.f32 %v292_v8, %v224_v12 }
 0x1b4   :  { %v228_v14 = vmax.f32 %v225_v13, 0.0 }
 0x1b6   :  { %268 = vmatmul.f32.gmra.mxu3 %v228_v14 }
 0x231   :  { %v266_v16 = vpop.f32.mrf.mxu3 }
 0x232   :  { %v267_v17 = vadd.f32 %v293_v15, %v266_v16 }
 0x234   :  { %273 = vst.msk [vmem:[%s584_s9] sm:$0xff] %vm272_vm1, %v267_v17 }
 0x239   :  { %v269_v18 = vpop.f32.mrf.mxu3 }
 0x23a   :  { %v270_v19 = vadd.f32 %v293_v15, %v269_v18 }
 0x23c   :  { %274 = vst.msk [vmem:[%s584_s9 + $0x8] sm:$0xff] %vm272_vm1, %v270_v19 }
 0x23d   :  { %279 = vsyncpa [#allocation3], 1 }
 0x23e   :  { %280 = vsyncpa [#allocation5], 1 }
 0x23f   :  { %281 = vsyncpa [#allocation8], 1 }

</bundles_post_ra>
